<compile_context>
chip_gen: v7x
topology: tpu7x:2x2x1
jax: 0.10.0
libtpu: 0.0.40
codegen_flags: <defaults>
</compile_context>

<pallas_src>
import jax
import jax.numpy as jnp
from jax.experimental import pallas as pl
from jax.experimental.pallas import tpu as pltpu

EPS = 1e-5
_LANE = 128


def _round_up(x, m):
    return (x + m - 1) // m * m


def _vmem_capacity_bytes():
    cap = 64 * 1024 * 1024  # conservative default (v7x per-TC VMEM)
    try:
        info = pltpu.get_tpu_info()
        cap = int(getattr(info, "vmem_capacity_bytes", cap) or cap)
    except Exception:
        pass
    return cap


def _pick_rows(total_rows, cost_fn, budget):
    """Largest multiple-of-8 divisor t of total_rows with cost_fn(t) <= budget."""
    best = None
    t = 8
    while t <= total_rows:
        if total_rows % t == 0 and cost_fn(t) <= budget:
            best = t
        t += 8
    return best


# --------------------------------------------------------------------------
# Kernels
# --------------------------------------------------------------------------

def _make_fused_kernel(count, eps):
    inv = 1.0 / float(count)

    def kernel(x_ref, o_ref):
        # x_ref: whole per-group slab (group axis squeezed by the BlockSpec).
        x = x_ref[...].astype(jnp.float32)
        mean = jnp.sum(x) * inv
        xc = x - mean
        var = jnp.sum(xc * xc) * inv               # exact two-pass biased variance
        rstd = jax.lax.rsqrt(var + eps)            # EUP
        o_ref[...] = (xc * rstd).astype(o_ref.dtype)

    return kernel


def _make_stats_kernel(count, eps):
    inv = 1.0 / float(count)

    def kernel(x_ref, scale_ref, bias_ref, acc_s, acc_q):
        # x_ref block: (N, ts, 128) slab of one group; acc_*: (8,128) f32 partials.
        k = pl.program_id(1)

        @pl.when(k == 0)
        def _():
            acc_s[...] = jnp.zeros_like(acc_s)
            acc_q[...] = jnp.zeros_like(acc_q)

        x = x_ref[...].astype(jnp.float32)
        # Lane/sublane-shaped partial sums: pure vreg adds per step; the cross-lane
        # (XLU) reduce is deferred to the finalize below.
        s_p = jnp.sum(x, axis=0)                   # (ts, 128)
        q_p = jnp.sum(x * x, axis=0)               # (ts, 128)
        ts = s_p.shape[0]
        acc_s[...] += jnp.sum(s_p.reshape(ts // 8, 8, _LANE), axis=0)
        acc_q[...] += jnp.sum(q_p.reshape(ts // 8, 8, _LANE), axis=0)

        @pl.when(k == pl.num_programs(1) - 1)
        def _():
            mean = jnp.sum(acc_s[...]) * inv
            # Clamped E[x^2] - mean^2 (f32 accumulators) for the streamed path.
            var = jnp.maximum(jnp.sum(acc_q[...]) * inv - mean * mean, 0.0)
            rstd = jax.lax.rsqrt(var + eps)        # EUP
            # Folded so pass 2 is a single multiply-add per element.
            scale_ref[...] = jnp.broadcast_to(rstd, scale_ref.shape)
            bias_ref[...] = jnp.broadcast_to(-mean * rstd, bias_ref.shape)

    return kernel


def _norm_kernel(scale_ref, bias_ref, x_ref, o_ref):
    # scale/bias: whole (G,) f32 arrays in SMEM; x_ref/o_ref: (N, ts, 128) blocks.
    gi = pl.program_id(0)
    s = scale_ref[gi]
    b = bias_ref[gi]
    o_ref[...] = (x_ref[...].astype(jnp.float32) * s + b).astype(o_ref.dtype)


# --------------------------------------------------------------------------
# Wrapper
# --------------------------------------------------------------------------

def group_batch_norm(x, num_rep, dim_rep, eps=EPS, *, force_streamed_rows=None):
    """x: (N, C, H, W) with C == num_rep * dim_rep. Returns same shape/dtype."""
    n, c, h, w = x.shape
    assert c == num_rep * dim_rep
    g = num_rep
    f = dim_rep * h * w                 # per-group features per sample
    count = n * f                       # reduction count per group
    itemsize = jnp.dtype(x.dtype).itemsize
    sub = max(8, 32 // itemsize)        # sublane packing: f32 -> 8, bf16 -> 16

    cap = _vmem_capacity_bytes()
    vmem_limit = min(3 * cap // 4, 96 * 1024 * 1024)      # v5e/v6e: 96 MiB, v7x: 48 MiB
    big_limit = min(cap - 8 * 1024 * 1024, 112 * 1024 * 1024)

    use_4d = (f % _LANE == 0)
    if use_4d:
        s_rows = f // _LANE
        xr = x.reshape(n, g, s_rows, _LANE)                # free contiguous reshape
        full_block = (n, None, s_rows, _LANE)
        full_map = lambda gi: (0, gi, 0, 0)
        slab_dtype = n * _round_up(s_rows, sub) * _LANE * itemsize
        slab_f32 = n * _round_up(s_rows, 8) * _LANE * 4
    else:
        s_rows = 0
        xr = x.reshape(n, g, f)
        full_block = (n, None, f)
        full_map = lambda gi: (0, gi, 0)
        slab_dtype = _round_up(n, sub) * _round_up(f, _LANE) * itemsize
        slab_f32 = _round_up(n, 8) * _round_up(f, _LANE) * 4

    # Fused-path VMEM need: double-buffered in + out blocks plus ~2 f32 temporaries.
    fused_need = 4 * slab_dtype + 2 * slab_f32
    fused_ok = fused_need <= (vmem_limit * 3) // 4

    # Streamed-path tile sizing (per pass): pass 1 double-buffers only its input,
    # pass 2 double-buffers input and output.
    ts1 = ts2 = None
    if use_4d and s_rows % 8 == 0:
        row_dtype = n * _LANE * itemsize
        row_f32 = n * _LANE * 4
        budget = (vmem_limit * 7) // 10
        ts1 = _pick_rows(s_rows, lambda t: 2 * t * row_dtype + 2 * t * row_f32, budget)
        ts2 = _pick_rows(s_rows, lambda t: 4 * t * row_dtype + 2 * t * row_f32, budget)
    streamed_ok = ts1 is not None and ts2 is not None

    if force_streamed_rows is not None and use_4d and force_streamed_rows % 8 == 0 \
            and s_rows % force_streamed_rows == 0:
        ts1 = ts2 = force_streamed_rows
        streamed_ok, fused_ok = True, False

    # ---------------- fused single-pass path ----------------
    if fused_ok or not streamed_ok:
        # TODO(synk): shapes with F % 128 != 0 and slabs larger than VMEM fall
        # through here with a raised limit; they would need masked streaming.
        limit = vmem_limit if fused_ok else big_limit
        y = pl.pallas_call(
            _make_fused_kernel(count, eps),
            out_shape=jax.ShapeDtypeStruct(xr.shape, x.dtype),
            grid_spec=pltpu.PrefetchScalarGridSpec(
                num_scalar_prefetch=0,
                grid=(g,),
                in_specs=[pl.BlockSpec(full_block, full_map)],
                out_specs=pl.BlockSpec(full_block, full_map),
            ),
            compiler_params=pltpu.CompilerParams(
                dimension_semantics=("parallel",),
                vmem_limit_bytes=limit,
            ),
        )(xr)
        return y.reshape(n, c, h, w)

    # ---------------- streamed two-pass path ----------------
    # Pass 1: per-group scale / bias (single read of x).
    scale_blk, bias_blk = pl.pallas_call(
        _make_stats_kernel(count, eps),
        out_shape=(jax.ShapeDtypeStruct((g, 8, _LANE), jnp.float32),
                   jax.ShapeDtypeStruct((g, 8, _LANE), jnp.float32)),
        grid_spec=pltpu.PrefetchScalarGridSpec(
            num_scalar_prefetch=0,
            grid=(g, s_rows // ts1),
            in_specs=[pl.BlockSpec((n, None, ts1, _LANE),
                                   lambda gi, ki: (0, gi, ki, 0))],
            out_specs=[pl.BlockSpec((1, 8, _LANE), lambda gi, ki: (gi, 0, 0)),
                       pl.BlockSpec((1, 8, _LANE), lambda gi, ki: (gi, 0, 0))],
            scratch_shapes=[pltpu.VMEM((8, _LANE), jnp.float32),
                            pltpu.VMEM((8, _LANE), jnp.float32)],
        ),
        compiler_params=pltpu.CompilerParams(
            dimension_semantics=("parallel", "arbitrary"),
            vmem_limit_bytes=vmem_limit,
        ),
    )(xr)

    # Tiny (G,)-sized slice between the passes (negligible in the large-slab
    # regime where this path runs; the heavy finalize math already ran in-kernel).
    scale = scale_blk[:, 0, 0]
    bias = bias_blk[:, 0, 0]

    # Pass 2: y = x * scale + bias, fully parallel over (group, feature-tile).
    y = pl.pallas_call(
        _norm_kernel,
        out_shape=jax.ShapeDtypeStruct(xr.shape, x.dtype),
        grid_spec=pltpu.PrefetchScalarGridSpec(
            num_scalar_prefetch=0,
            grid=(g, s_rows // ts2),
            in_specs=[pl.BlockSpec(memory_space=pltpu.MemorySpace.SMEM),
                      pl.BlockSpec(memory_space=pltpu.MemorySpace.SMEM),
                      pl.BlockSpec((n, None, ts2, _LANE),
                                   lambda gi, ki: (0, gi, ki, 0))],
            out_specs=pl.BlockSpec((n, None, ts2, _LANE),
                                   lambda gi, ki: (0, gi, ki, 0)),
        ),
        compiler_params=pltpu.CompilerParams(
            dimension_semantics=("parallel", "parallel"),
            vmem_limit_bytes=vmem_limit,
        ),
    )(scale, bias, xr)
    return y.reshape(n, c, h, w)


# --------------------------------------------------------------------------
# Reference & self-test
# --------------------------------------------------------------------------

def _reference(x, num_rep, dim_rep, eps=EPS):
    n, c, h, w = x.shape
    x5 = x.reshape(n, num_rep, dim_rep, h, w).astype(jnp.float32)
    mean = jnp.mean(x5, axis=(0, 2, 3, 4), keepdims=True)
    var = jnp.mean((x5 - mean) ** 2, axis=(0, 2, 3, 4), keepdims=True)
    y = (x5 - mean) * jax.lax.rsqrt(var + eps)
    return y.reshape(n, c, h, w).astype(x.dtype)


if __name__ == "__main__":
    key = jax.random.PRNGKey(0)

    # Small shape -> fused single-pass kernel (1 read + 1 write of x).
    num_rep, dim_rep = 2, 2              # C = 4
    N, H, W = 2, 16, 16
    x = jax.random.normal(key, (N, num_rep * dim_rep, H, W), dtype=jnp.float32)
    y = jax.block_until_ready(group_batch_norm(x, num_rep, dim_rep))
    assert y.shape == x.shape and y.dtype == x.dtype
    assert jnp.allclose(y, _reference(x, num_rep, dim_rep), atol=1e-4, rtol=1e-4)

    # Larger feature axis forced through the two-pass streamed path so the
    # stats-accumulate + normalize kernels are also exercised (2 feature tiles).
    num_rep2, dim_rep2 = 2, 8            # C = 16, F = 2048, S = 16
    x2 = jax.random.normal(jax.random.PRNGKey(0), (2, num_rep2 * dim_rep2, 16, 16),
                           dtype=jnp.float32)
    y2 = jax.block_until_ready(
        group_batch_norm(x2, num_rep2, dim_rep2, force_streamed_rows=8))
    assert y2.shape == x2.shape and y2.dtype == x2.dtype
    assert jnp.allclose(y2, _reference(x2, num_rep2, dim_rep2), atol=1e-4, rtol=1e-4)

    print("KERNEL_OK")
</pallas_src>

<mosaic_0001>
module attributes {stable_mosaic.version = 11 : i64} {
  func.func @kernel(%arg0: i32, %arg1: memref<2x1x4x128xf32, #tpu.memory_space<vmem>>, %arg2: memref<2x1x4x128xf32, #tpu.memory_space<vmem>>) attributes {dimension_semantics = [#tpu.dimension_semantics<parallel>], iteration_bounds = array<i64: 2>, scalar_prefetch = 0 : i64, scratch_operands = 0 : i64, tpu.core_type = #tpu.core_type<tc>, window_params = [{transform_indices = @transform_0, window_bounds = array<i64: 2, 1, 4, 128>}, {transform_indices = @transform_1, window_bounds = array<i64: 2, 1, 4, 128>}]} {
    %c0 = arith.constant 0 : index
    %c0_0 = arith.constant 0 : index
    %c0_1 = arith.constant 0 : index
    %c0_2 = arith.constant 0 : index
    %0 = vector.load %arg1[%c0, %c0_0, %c0_1, %c0_2] : memref<2x1x4x128xf32, #tpu.memory_space<vmem>>, vector<2x1x4x128xf32>
    %1 = vector.shape_cast %0 : vector<2x1x4x128xf32> to vector<2x4x128xf32>
    %2 = vector.shape_cast %1 : vector<2x4x128xf32> to vector<1x2x4x128xf32>
    %cst = arith.constant dense<0.000000e+00> : vector<1xf32>
    %3 = vector.multi_reduction <add>, %2, %cst [1, 2, 3] : vector<1x2x4x128xf32> to vector<1xf32>
    %4 = vector.shape_cast %3 : vector<1xf32> to vector<1x1x1x1xf32>
    %5 = vector.extract %4[0, 0, 0, 0] : f32 from vector<1x1x1x1xf32>
    %cst_3 = arith.constant 9.765625E-4 : f32
    %6 = arith.mulf %5, %cst_3 : f32
    %7 = vector.broadcast %6 : f32 to vector<2x4x128xf32>
    %8 = arith.subf %1, %7 : vector<2x4x128xf32>
    %9 = arith.mulf %8, %8 : vector<2x4x128xf32>
    %10 = vector.shape_cast %9 : vector<2x4x128xf32> to vector<1x2x4x128xf32>
    %cst_4 = arith.constant dense<0.000000e+00> : vector<1xf32>
    %11 = vector.multi_reduction <add>, %10, %cst_4 [1, 2, 3] : vector<1x2x4x128xf32> to vector<1xf32>
    %12 = vector.shape_cast %11 : vector<1xf32> to vector<1x1x1x1xf32>
    %13 = vector.extract %12[0, 0, 0, 0] : f32 from vector<1x1x1x1xf32>
    %cst_5 = arith.constant 9.765625E-4 : f32
    %14 = arith.mulf %13, %cst_5 : f32
    %cst_6 = arith.constant 9.99999974E-6 : f32
    %15 = arith.addf %14, %cst_6 : f32
    %16 = math.rsqrt %15 : f32
    %17 = vector.broadcast %16 : f32 to vector<2x4x128xf32>
    %18 = arith.mulf %8, %17 : vector<2x4x128xf32>
    %c0_7 = arith.constant 0 : index
    %c0_8 = arith.constant 0 : index
    %c0_9 = arith.constant 0 : index
    %c0_10 = arith.constant 0 : index
    %19 = vector.load %arg2[%c0_7, %c0_8, %c0_9, %c0_10] : memref<2x1x4x128xf32, #tpu.memory_space<vmem>>, vector<2x1x4x128xf32>
    %20 = vector.shape_cast %19 : vector<2x1x4x128xf32> to vector<2x4x128xf32>
    %21 = vector.shape_cast %18 : vector<2x4x128xf32> to vector<2x1x4x128xf32>
    tpu.vector_store %arg2[%c0_7, %c0_8, %c0_9, %c0_10], %21 {strides = array<i32>} : memref<2x1x4x128xf32, #tpu.memory_space<vmem>>, vector<2x1x4x128xf32>,
    return
  }
  func.func @transform_0(%arg0: i32) -> (i32, i32, i32, i32) {
    %c0_i32 = arith.constant 0 : i32
    %c0_i32_0 = arith.constant 0 : i32
    %c0_i32_1 = arith.constant 0 : i32
    %c0_i32_2 = arith.constant 0 : i32
    return %c0_i32, %arg0, %c0_i32_0, %c0_i32_1 : i32, i32, i32, i32
  }
  func.func @transform_1(%arg0: i32) -> (i32, i32, i32, i32) {
    %c0_i32 = arith.constant 0 : i32
    %c0_i32_0 = arith.constant 0 : i32
    %c0_i32_1 = arith.constant 0 : i32
    %c0_i32_2 = arith.constant 0 : i32
    return %c0_i32, %arg0, %c0_i32_0, %c0_i32_1 : i32, i32, i32, i32
  }
}

</mosaic_0001>

<bundles_post_ra>
// kernel: tpu_custom_call.1
= control target key start
LH: loop header
LB: loop body
LE: loop exit
PB: predicated region body
PF: predicated region fallthrough
CT: control target
= control target key end

     0   :  { %6 = vsyncpa [#allocation3], 0  ;;  %s623_s0 = inlined_call_operand.hbm [shape: f32[2,2,4,128], index: 0, kind: input, shape index: {}]   ;;  %s624_s1 = inlined_call_operand.hbm [shape: f32[2,2,4,128], index: 1, kind: output, shape index: {}]  }
   0x1   :  { %8 = vsyncpa [#allocation3 + $0x1], 0 }
   0x2   :  { %9 = vsyncpa [#allocation4], 0 }
   0x3   :  { %11 = vsyncpa [#allocation4 + $0x1], 0  ;;  %s451_s6 = smov 0   ;;  %s453_s7 = smov 0  }
   0x4   :  { %s455_s8 = smov 0   ;;  %s457_s9 = smov 0  }
   0x5 LB: > { %s472_s10 = sadd.s32 4294967295, %s431_s9   ;;  %s263_s11 = sadd.s32 4294967294, %s431_s9   ;;  %s431_s9 = sphi %s457_s9, %s638_s9   ;;  %s427_s8 = sphi %s455_s8, %s637_s8   ;;  %s423_s7 = sphi %s453_s7, %s636_s7   ;;  %s419_s6 = sphi %s451_s6, %s635_s6  }
   0x6   : > { %s476_s12 = sadd.s32 1, %s431_s9   ;;  %s24_s13 = sadd.s32 1, %s427_s8 }
   0x7   : > { %s21_s14 = ssub.s32 %s431_s9, %s476_s12  ;;  %p31_p0 = scmp.ne.s32.totalorder %s427_s8, %s423_s7 }
   0x8   : > { %p22_p1 = scmp.eq.s32.totalorder %s21_s14, 0  ;;  %p32_p2 = scmp.eq.s32.totalorder %s431_s9, 0 }
   0x9   : > { %p37_p3 = scmp.ne.s32.totalorder %s423_s7, %s419_s6  ;;  %p38_p4 = scmp.eq.s32.totalorder %s472_s10, 0 }
   0xa   : > { %s488_s15 = scalar_select %p22_p1, %s427_s8, %s24_s13  }
   0xb   : > { %p490_p5 = por %p32_p2, %p31_p0  ;;  %p494_p6 = por %p38_p4, %p37_p3 }
   0xc   : > { %p61_p7 = scmp.eq.s32.totalorder %s472_s10, 1  ;;  %p67_p8 = scmp.eq.s32.totalorder %s263_s11, 1 }
   0xd   : > { %p293_p10 = scmp.lt.s32.totalorder %s431_s9, 2  ;;  %s87_s20 = sand.u32 1, %s427_s8  }
   0xe   : > { %p501_p11 = por %p61_p7, %p31_p0  ;;  %p505_p12 = por %p67_p8, %p37_p3 }
   0xf   : > { %s267_s21 = sshll.u32 %s431_s9, 6  ;;  %s266_s22 = sshll.u32 %s87_s20, 3 }
  0x10   : > { %s628_s18 = scalar_select %p501_p11, 1, 0 }
  0x11   : > { %s629_s19 = scalar_select %p505_p12, 1, 0 }
  0x12   : > { %s514_s25 = scalar_lea.hbm %s623_s0, %s267_s21  ;;  %s91_s26 = scalar_lea.vmem [#allocation2], %s266_s22 }
  0x13   : > { %s97_s27 = sshll.u32 %s91_s26, 4  ;;  %p518_p13 = pnand %p293_p10, %p490_p5  ;;  %s522_s27 = int_to_ptr.vmem [resolvable:$true] %s97_s27 }
  0x14   : > { %s525_s29 = scalar_lea.sflag [#allocation3], %s87_s20  ;;  %s335_s30 = scalar_lea.hbm %s514_s25, 128 }
  0x15   : > { %p336_p1 = scmp.ne.s32.totalorder %s514_s25, %s335_s30  ;;  %p337_p2 = pneg %p518_p13 }
  0x16   : > { %s340_s4 = scalar_lea.hbm %s623_s0, 256  ;;  %p341_p5 = scmp.lt.u32.totalorder %s514_s25, %s623_s0 }
  0x17   : > { %p338_p3 = pnand %p337_p2, %p336_p1  ;;  %p342_p7 = scmp.lt.u32.totalorder %s340_s4, %s335_s30 }
  0x18   : > { %p344_p10 = scmp.lt.u32.totalorder %s335_s30, %s514_s25 }
  0x19   : > { %p339_p4 = pneg %p338_p3  ;;  %p343_p8 = por %p342_p7, %p341_p5 }
  0x1b   : > { %p345_p9 = por %p344_p10, %p343_p8 }
  0x1d   : > { %p346_p0 = pnand %p345_p9, %p339_p4 }
  0x1f   : > { %349 = shalt.err (!%p346_p0)
}
  0x20   : > { %s350_s13 = scalar_lea.vmem %s522_s27, 128  ;;  %s433_s14 = smov [#allocation2]  }
  0x21   : > { %p351_p1 = scmp.ne.s32.totalorder %s522_s27, %s350_s13  ;;  %s355_s16 = sshll.u32 %s433_s14, 4  ;;  %s356_s16 = int_to_ptr.vmem [resolvable:$false] %s355_s16 }
  0x22   : > { %s357_s20 = scalar_lea.vmem %s356_s16, 256  ;;  %p358_p11 = scmp.lt.s32.totalorder %s522_s27, %s356_s16 }
  0x23   : > { %p353_p3 = pnand %p351_p1, %p337_p2  ;;  %p359_p5 = scmp.lt.s32.totalorder %s357_s20, %s350_s13 }
  0x25   : > { %p354_p12 = pneg %p353_p3  ;;  %p360_p7 = por %p359_p5, %p358_p11 }
  0x27   : > { %p361_p8 = pnand %p360_p7, %p354_p12 }
  0x29   : > { %364 = shalt.err (!%p361_p8)
}
  0x2a   : > { %s434_s21 = smov 128   ;;  %s435_s22 = smov 64  }
  0x2b   : > { %s436_s23 = smov 4   ;;  %p105_p9 = scmp.lt.s32.totalorder %s431_s9, 3 }
  0x2c   : > { %288 = dma.hbm_to_vmem [thread:$0]  (!%p518_p13), %s514_s25, 128, %s522_s27, %s525_s29, %s434_s21, %s435_s22, %s436_s23  }
  0x2d   : > { %p631_p0 = scmp.ge.s32.totalorder %s431_s9, 1 }
  0x2f   : > { %p106_p2 = pnand %p631_p0, %p105_p9 }
  0x30   : > { %s557_s24 = sand.u32 (!%p106_p2), 1, %s423_s7  }
  0x31   : > { %109 = sbr.rel (%p106_p2) target bundleno = 564 (0x234), region = 24  ;;  %s269_s26 = sshll.u32 (!%p106_p2), %s557_s24, 3 }
  0x32   : > { %s112_s30 = scalar_lea.sflag (!%p106_p2), [#allocation3], %s557_s24  ;;  %s115_s2 = scalar_lea.vmem (!%p106_p2), [#allocation2], %s269_s26 }
  0x38   : > { %410 = dma.done.wait (%p494_p6), %s112_s30, 128  }
  0x39   : > { %412 = vsyncadd (%p494_p6), %s112_s30, 4294967168  ;;  %vm136_vm0 = vcmask 1043456   ;;  %v134_v0 = vld [vmem:[%s115_s2] sm:$0xf]  ;;  %v135_v1 = vld [vmem:[%s115_s2 + $0x4] sm:$0xf] }
  0x3a   : > { %v137_v2 = vsel %vm136_vm0, %v134_v0, 0.0  ;;  %v138_v3 = vsel %vm136_vm0, %v135_v1, 0.0  ;;  %s133_s3 = scalar_lea.vmem [#allocation5], %s269_s26  ;;  %s272_s5 = sshll.u32 %s472_s10, 6 }
  0x3b   : > { %v139_v4 = vadd.f32 %v138_v3, %v137_v2  ;;  %s190_s4 = sshll.u32 %s133_s3, 4  ;;  %s579_s16 = scalar_lea.hbm %s624_s1, %s272_s5  ;;  %s574_s4 = int_to_ptr.vmem [resolvable:$true] %s190_s4 }
  0x3c   : > { %s178_s20 = scalar_lea.sflag [#allocation4], %s557_s24  ;;  %s365_s21 = scalar_lea.vmem %s574_s4, 128 }
  0x3d   : > { %140 = vadd.xlane.f32.xlu0 %v139_v4  ;;  %p366_p6 = scmp.ne.s32.totalorder %s574_s4, %s365_s21  ;;  %p632_p11 = scmp.ne.s32.totalorder %s628_s18, 0 }
  0x3e   : > { %s437_s10 = smov [#allocation5]  }
  0x3f   : > { %p367_p12 = pnand %p366_p6, %p632_p11  ;;  %s369_s22 = sshll.u32 %s437_s10, 4  ;;  %s370_s22 = int_to_ptr.vmem [resolvable:$false] %s369_s22 }
  0x40   : > { %s371_s23 = scalar_lea.vmem %s370_s22, 256  ;;  %p372_p4 = scmp.lt.s32.totalorder %s574_s4, %s370_s22 }
  0x41   : > { %p368_p13 = pneg %p367_p12  ;;  %p373_p10 = scmp.lt.s32.totalorder %s371_s23, %s365_s21 }
  0x43   : > { %p374_p1 = por %p373_p10, %p372_p4 }
  0x45   : > { %p375_p3 = pnand %p374_p1, %p368_p13 }
  0xca   : > { %v141_v5 = vpop.xlane.xlu0 %140 }
  0xcb   : > { %v142_v6 = vrot.slane %v141_v5, 4 }
  0xcd   : > { %v143_v7 = vadd.f32 %v142_v6, %v141_v5 }
  0xcf   : > { %v144_v8 = vrot.slane %v143_v7, 2 }
  0xd1   : > { %v145_v9 = vadd.f32 %v144_v8, %v143_v7 }
  0xd3   : > { %v146_v10 = vrot.slane %v145_v9, 1 }
  0xd5   : > { %v147_v11 = vadd.f32 %v146_v10, %v145_v9 }
  0xd7   : > { %275 = vpush %v147_v11 }
 0x108   : > { %s276_s25 = spop %275 }
 0x109   : > { %s149_s17 = smul.f32 0.0009765625, %s276_s25 }
 0x10b   : > { %v150_v12 = vstv %s149_s17 }
 0x10c   : > { %v151_v13 = vsub.f32 %v134_v0, %v150_v12  ;;  %v152_v14 = vsub.f32 %v135_v1, %v150_v12 }
 0x10e   : > { %v153_v15 = vmul.f32 %v151_v13, %v151_v13  ;;  %v154_v16 = vmul.f32 %v152_v14, %v152_v14 }
 0x110   : > { %v155_v17 = vsel %vm136_vm0, %v153_v15, 0.0  ;;  %v156_v18 = vsel %vm136_vm0, %v154_v16, 0.0 }
 0x111   : > { %v157_v19 = vadd.f32 %v156_v18, %v155_v17 }
 0x113   : > { %158 = vadd.xlane.f32.xlu0 %v157_v19 }
 0x1a0   : > { %v159_v20 = vpop.xlane.xlu0 %158 }
 0x1a1   : > { %v160_v21 = vrot.slane %v159_v20, 4 }
 0x1a3   : > { %v161_v22 = vadd.f32 %v160_v21, %v159_v20 }
 0x1a5   : > { %v162_v23 = vrot.slane %v161_v22, 2 }
 0x1a7   : > { %v163_v24 = vadd.f32 %v162_v23, %v161_v22 }
 0x1a9   : > { %v164_v25 = vrot.slane %v163_v24, 1 }
 0x1ab   : > { %v165_v26 = vadd.f32 %v164_v25, %v163_v24 }
 0x1ad   : > { %277 = vpush %v165_v26 }
 0x1de   : > { %s278_s27 = spop %277 }
 0x1df   : > { %s167_s28 = smul.f32 0.0009765625, %s278_s27 }
 0x1e1   : > { %s168_s29 = sadd.f32 1e-05, %s167_s28 }
 0x1e3   : > { %v169_v27 = vstv %s168_s29 }
 0x1e4   : > { %333 = vrsqrt.f32 %v169_v27 }
 0x1ee   : > { %v334_v28 = vpop.eup %333 }
 0x1ef   : > { %279 = vpush %v334_v28 }
 0x220   : > { %s280_s11 = spop %279 }
 0x221   : > { %v172_v29 = vstv %s280_s11 }
 0x222   : > { %v173_v30 = vmul.f32 %v172_v29, %v151_v13  ;;  %v174_v31 = vmul.f32 %v172_v29, %v152_v14 }
 0x224   : > { %175 = vst [vmem:[%s133_s3] sm:$0xf] %v173_v30  ;;  %176 = vst [vmem:[%s133_s3 + $0x4] sm:$0xf] %v174_v31 }
 0x225   : > { %378 = shalt.err (!%p375_p3)
}
 0x226   : > { %s379_s26 = scalar_lea.hbm %s579_s16, 128  ;;  %s383_s25 = scalar_lea.hbm %s624_s1, 256 }
 0x227   : > { %p380_p5 = scmp.ne.s32.totalorder %s579_s16, %s379_s26  ;;  %p384_p9 = scmp.lt.u32.totalorder %s579_s16, %s624_s1 }
 0x228   : > { %p385_p0 = scmp.lt.u32.totalorder %s383_s25, %s379_s26  ;;  %p387_p6 = scmp.lt.u32.totalorder %s379_s26, %s579_s16 }
 0x229   : > { %p381_p7 = pnand %p380_p5, %p632_p11 }
 0x22a   : > { %p386_p2 = por %p385_p0, %p384_p9 }
 0x22b   : > { %p382_p8 = pneg %p381_p7 }
 0x22c   : > { %p388_p12 = por %p387_p6, %p386_p2 }
 0x22e   : > { %p389_p13 = pnand %p388_p12, %p382_p8 }
 0x230   : > { %392 = shalt.err (!%p389_p13)
}
 0x231   : > { %s438_s28 = smov 64   ;;  %s439_s29 = smov 128  }
 0x232   : > { %s440_s3 = smov 4  }
 0x233   : > { %283 = dma.vmem_to_hbm [thread:$0]  (%p632_p11), %s574_s4, 128, %s579_s16, %s178_s20, %s438_s28, %s439_s29, %s440_s3  }
 0x234 PF: > { %s205_s5 = sand.u32 1, %s419_s6   ;;  %p633_p4 = scmp.ne.s32.totalorder %s629_s19, 0 }
 0x235   : > { %p634_p10 = scmp.ge.s32.totalorder %s431_s9, 2  ;;  %s206_s11 = scalar_lea.sflag [#allocation4], %s205_s5 }
 0x237   : > { %p290_p1 = pnand %p634_p10, %p633_p4 }
 0x239   : > { %414 = dma.done.wait (!%p290_p1), %s206_s11, 128  }
 0x23a   : > { %416 = vsyncadd (!%p290_p1), %s206_s11, 4294967168  ;;  %p14_p3 = scmp.ge.s32.totalorder %s476_s12, 4   ;;  %s635_s6 = smov %s423_s7 }
 0x23b   : > { %s636_s7 = smov %s427_s8  ;;  %s637_s8 = smov %s488_s15 }
 0x23c   : > { %s638_s9 = smov %s476_s12  ;;  %16 = sbr.rel (!%p14_p3) target bundleno = 5 (0x5), region = 69 }
 0x243   :  { %211 = vsyncpa [#allocation3], 1 }
 0x244   :  { %213 = vsyncpa [#allocation3 + $0x1], 1 }
 0x245   :  { %214 = vsyncpa [#allocation4], 1 }
 0x246   :  { %216 = vsyncpa [#allocation4 + $0x1], 1 }

</bundles_post_ra>
